<compile_context>
chip_gen: v7x
topology: tpu7x:2x2x1
jax: 0.10.0
libtpu: 0.0.40
codegen_flags: <defaults>
</compile_context>

<pallas_src>
import jax
import jax.numpy as jnp
from jax.experimental import pallas as pl
from jax.experimental.pallas import tpu as pltpu


# --------------------------------------------------------------------------- #
# Kernel: elementwise swish on one (block_rows, lanes) tile
# --------------------------------------------------------------------------- #
def _swish_kernel(x_ref, o_ref):
    # Load in storage dtype, compute in f32 (works on v5e/v6e/v7x), store back.
    # Sigmoid via a single tanh EUP op per element: sigmoid(x) = 0.5*(tanh(x/2)+1).
    x = x_ref[...].astype(jnp.float32)
    sig = 0.5 * (jnp.tanh(0.5 * x) + 1.0)
    o_ref[...] = (x * sig).astype(o_ref.dtype)


# --------------------------------------------------------------------------- #
# Wrapper
# --------------------------------------------------------------------------- #
def swish_pallas(x, *, max_block_rows=2048, lanes=512, min_pallas_elems=16384):
    """Swish activation x * sigmoid(x), elementwise, any shape / float dtype."""
    orig_shape = x.shape
    orig_dtype = x.dtype
    n = x.size
    if n == 0:
        return x

    # Tiny-input escape hatch: kernel launch + grid overhead would dominate;
    # XLA's fused elementwise path is already optimal here.
    if n < min_pallas_elems:
        xf32 = x.astype(jnp.float32)
        return (xf32 * (0.5 * (jnp.tanh(0.5 * xf32) + 1.0))).astype(orig_dtype)

    rows = pl.cdiv(n, lanes)

    # Tile height: cap at max_block_rows (4 MiB f32 tile at lanes=512), but
    # keep >= 4 grid iterations so both v7x TensorCores get work and the DMA
    # pipeline stays full; multiples of 8 sublanes.
    block_rows = min(max_block_rows, max(8, pl.cdiv(pl.cdiv(rows, 4), 8) * 8))
    grid = (pl.cdiv(rows, block_rows),)

    xf = jnp.ravel(x)
    divisible = (n % lanes) == 0
    if not divisible:
        # Pad only the sub-lane remainder (< lanes elements).  The partial last
        # row-block is handled by Pallas' masked edge block, not by padding.
        xf = jnp.pad(xf, (0, rows * lanes - n))
    x2 = xf.reshape(rows, lanes)  # free bitcast when `divisible`

    out2 = pl.pallas_call(
        _swish_kernel,
        out_shape=jax.ShapeDtypeStruct((rows, lanes), orig_dtype),
        grid=grid,
        in_specs=[pl.BlockSpec((block_rows, lanes), lambda i: (i, 0))],
        out_specs=pl.BlockSpec((block_rows, lanes), lambda i: (i, 0)),
        compiler_params=pltpu.CompilerParams(
            dimension_semantics=("parallel",),
            # Working set: in+out double-buffered = 4 * tile <= 16 MiB (f32);
            # leave headroom, still well under every generation's VMEM.
            vmem_limit_bytes=40 * 1024 * 1024,
        ),
    )(x2)

    out = out2.reshape(-1)
    if not divisible:
        out = out[:n]
    return out.reshape(orig_shape)


# --------------------------------------------------------------------------- #
# Demo / self-test
# --------------------------------------------------------------------------- #
if __name__ == "__main__":
    # TODO(synk): torch's `inplace` in-place mul_ has no JAX equivalent
    # (immutable arrays); the functional result is identical.
    key = jax.random.PRNGKey(0)
    fwd = jax.jit(swish_pallas)

    # Shape consistent with the 3-D UNet context: [B, C, H, W, D].
    x = jax.random.normal(key, (2, 4, 16, 16, 16), dtype=jnp.float32)

    # float32 path (divisible by lane width -> no pad/unpad copies).
    out = jax.block_until_ready(fwd(x))
    ref = x * jax.nn.sigmoid(x)
    assert out.shape == x.shape and out.dtype == x.dtype
    assert jnp.allclose(out, ref, atol=1e-6, rtol=1e-6), "f32 swish mismatch"

    # bfloat16 path (bf16 at the HBM edge, f32 math in-kernel).
    xb = x.astype(jnp.bfloat16)
    outb = jax.block_until_ready(fwd(xb))
    xb32 = xb.astype(jnp.float32)
    refb = (xb32 * jax.nn.sigmoid(xb32)).astype(jnp.bfloat16)
    assert outb.shape == xb.shape and outb.dtype == jnp.bfloat16
    assert jnp.allclose(outb.astype(jnp.float32), refb.astype(jnp.float32),
                        atol=1e-2, rtol=1e-2), "bf16 swish mismatch"

    # Non-divisible size -> exercises lane-remainder pad + masked edge block.
    y = jax.random.normal(jax.random.PRNGKey(1), (5, 7, 33, 17), dtype=jnp.float32)
    outy = jax.block_until_ready(jax.jit(swish_pallas)(y))
    assert jnp.allclose(outy, y * jax.nn.sigmoid(y), atol=1e-6, rtol=1e-6), \
        "padded-path swish mismatch"

    # Tiny input -> plain-JAX escape hatch.
    z = jax.random.normal(jax.random.PRNGKey(2), (3, 5, 7, 11), dtype=jnp.float32)
    outz = jax.block_until_ready(jax.jit(swish_pallas)(z))
    assert jnp.allclose(outz, z * jax.nn.sigmoid(z), atol=1e-6, rtol=1e-6), \
        "tiny-path swish mismatch"

    print("KERNEL_OK")
</pallas_src>

<mosaic_0001>
module attributes {stable_mosaic.version = 11 : i64} {
  func.func @_swish_kernel(%arg0: i32, %arg1: memref<16x512xf32, #tpu.memory_space<vmem>>, %arg2: memref<16x512xf32, #tpu.memory_space<vmem>>) attributes {dimension_semantics = [#tpu.dimension_semantics<parallel>], iteration_bounds = array<i64: 4>, scalar_prefetch = 0 : i64, scratch_operands = 0 : i64, tpu.core_type = #tpu.core_type<tc>, window_params = [{transform_indices = @transform_0, window_bounds = array<i64: 16, 512>}, {transform_indices = @transform_1, window_bounds = array<i64: 16, 512>}]} {
    %c0 = arith.constant 0 : index
    %c0_0 = arith.constant 0 : index
    %0 = vector.load %arg1[%c0, %c0_0] : memref<16x512xf32, #tpu.memory_space<vmem>>, vector<16x512xf32>
    %cst = arith.constant 5.000000e-01 : f32
    %1 = vector.broadcast %cst : f32 to vector<16x512xf32>
    %2 = arith.mulf %1, %0 : vector<16x512xf32>
    %3 = math.tanh %2 : vector<16x512xf32>
    %cst_1 = arith.constant 1.000000e+00 : f32
    %4 = vector.broadcast %cst_1 : f32 to vector<16x512xf32>
    %5 = arith.addf %3, %4 : vector<16x512xf32>
    %cst_2 = arith.constant 5.000000e-01 : f32
    %6 = vector.broadcast %cst_2 : f32 to vector<16x512xf32>
    %7 = arith.mulf %6, %5 : vector<16x512xf32>
    %8 = arith.mulf %0, %7 : vector<16x512xf32>
    %c0_3 = arith.constant 0 : index
    %c0_4 = arith.constant 0 : index
    %9 = vector.load %arg2[%c0_3, %c0_4] : memref<16x512xf32, #tpu.memory_space<vmem>>, vector<16x512xf32>
    tpu.vector_store %arg2[%c0_3, %c0_4], %8 {strides = array<i32>} : memref<16x512xf32, #tpu.memory_space<vmem>>, vector<16x512xf32>,
    return
  }
  func.func @transform_0(%arg0: i32) -> (i32, i32) {
    %c0_i32 = arith.constant 0 : i32
    %c0_i32_0 = arith.constant 0 : i32
    return %arg0, %c0_i32 : i32, i32
  }
  func.func @transform_1(%arg0: i32) -> (i32, i32) {
    %c0_i32 = arith.constant 0 : i32
    %c0_i32_0 = arith.constant 0 : i32
    return %arg0, %c0_i32 : i32, i32
  }
}

</mosaic_0001>

<bundles_post_ra>
// kernel: swish_pallas.1
= control target key start
LH: loop header
LB: loop body
LE: loop exit
PB: predicated region body
PF: predicated region fallthrough
CT: control target
= control target key end

     0   :  { %s296_s6 = smov 0   ;;  %s330_s0 = inlined_call_operand.vmem [shape: f32[64,512], index: 0, kind: input, shape index: {}]   ;;  %s331_s1 = inlined_call_operand.vmem [shape: f32[64,512], index: 1, kind: output, shape index: {}]  }
   0x1 LB: > { %s239_s7 = sadd.s32 4294967295, %s284_s6   ;;  %p243_p0 = scmp.ge.s32.totalorder %s284_s6, 1  ;;  %s284_s6 = sphi %s296_s6, %s11_s6  }
   0x2   : > { %p89_p1 = scmp.lt.s32.totalorder %s284_s6, 5 }
   0x4   : > { %p90_p2 = pnand %p243_p0, %p89_p1 }
   0x5   : > { %s244_s8 = sshll.u32 (!%p90_p2), %s239_s7, 1 }
   0x6   : > { %93 = sbr.rel (%p90_p2) target bundleno = 44 (0x2c), region = 24  ;;  %p112_p3 = scmp.lt.s32.totalorder (!%p90_p2), %s244_s8, 7 }
   0xd   : > { %s333_s8 = smov (!%p112_p3, %s244_s8), 7 }
   0xe   : > { %s252_s9 = sshll.u32 %s333_s8, 5 }
   0xf   : > { %s116_s12 = scalar_lea.vmem %s330_s0, %s252_s9  ;;  %s317_s15 = scalar_lea.vmem %s331_s1, %s252_s9 }
  0x10   : > { %v125_v0 = vld [vmem:[%s116_s12] sm:$0xff]  ;;  %v126_v1 = vld [vmem:[%s116_s12 + $0x8] sm:$0xff]  ;;  %v127_v2 = vld [vmem:[%s116_s12 + $0x10] sm:$0xff] }
  0x11   : > { %v133_v3 = vmul.f32 0.5, %v125_v0  ;;  %v134_v4 = vmul.f32 0.5, %v126_v1  ;;  %v135_v5 = vmul.f32 0.5, %v127_v2  ;;  %v128_v6 = vld [vmem:[%s116_s12 + $0x18] sm:$0xff]  ;;  %v129_v7 = vld [vmem:[%s116_s12 + $0x20] sm:$0xff]  ;;  %v130_v8 = vld [vmem:[%s116_s12 + $0x28] sm:$0xff] }
  0x12   : > { %v136_v9 = vmul.f32 0.5, %v128_v6  ;;  %v131_v10 = vld [vmem:[%s116_s12 + $0x30] sm:$0xff]  ;;  %v137_v11 = vmul.f32 0.5, %v129_v7  ;;  %v132_v12 = vld [vmem:[%s116_s12 + $0x38] sm:$0xff]  ;;  %v138_v13 = vmul.f32 0.5, %v130_v8 }
  0x13   : > { %262 = vtanh.f32 %v133_v3  ;;  %v139_v14 = vmul.f32 0.5, %v131_v10  ;;  %v140_v15 = vmul.f32 0.5, %v132_v12 }
  0x14   : > { %264 = vtanh.f32 %v134_v4 }
  0x15   : > { %266 = vtanh.f32 %v135_v5 }
  0x16   : > { %268 = vtanh.f32 %v136_v9 }
  0x17   : > { %270 = vtanh.f32 %v137_v11 }
  0x18   : > { %272 = vtanh.f32 %v138_v13 }
  0x19   : > { %274 = vtanh.f32 %v139_v14 }
  0x1a   : > { %276 = vtanh.f32 %v140_v15 }
  0x1d   : > { %v263_v16 = vpop.eup %262 }
  0x1e   : > { %v265_v17 = vpop.eup %264  ;;  %v149_v18 = vadd.f32 1.0, %v263_v16 }
  0x1f   : > { %v267_v19 = vpop.eup %266  ;;  %v150_v20 = vadd.f32 1.0, %v265_v17 }
  0x20   : > { %v269_v21 = vpop.eup %268  ;;  %v157_v22 = vmul.f32 0.5, %v149_v18  ;;  %v151_v23 = vadd.f32 1.0, %v267_v19 }
  0x21   : > { %v271_v24 = vpop.eup %270  ;;  %v158_v25 = vmul.f32 0.5, %v150_v20  ;;  %v152_v26 = vadd.f32 1.0, %v269_v21 }
  0x22   : > { %v273_v27 = vpop.eup %272  ;;  %v165_v28 = vmul.f32 %v157_v22, %v125_v0  ;;  %v159_v29 = vmul.f32 0.5, %v151_v23  ;;  %v153_v30 = vadd.f32 1.0, %v271_v24 }
  0x23   : > { %v275_v31 = vpop.eup %274  ;;  %v166_v32 = vmul.f32 %v158_v25, %v126_v1  ;;  %v160_v33 = vmul.f32 0.5, %v152_v26  ;;  %v154_v34 = vadd.f32 1.0, %v273_v27 }
  0x24   : > { %v277_v35 = vpop.eup %276  ;;  %173 = vst [vmem:[%s317_s15] sm:$0xff] %v165_v28  ;;  %v167_v36 = vmul.f32 %v159_v29, %v127_v2  ;;  %v161_v37 = vmul.f32 0.5, %v153_v30  ;;  %v155_v38 = vadd.f32 1.0, %v275_v31 }
  0x25   : > { %174 = vst [vmem:[%s317_s15 + $0x8] sm:$0xff] %v166_v32  ;;  %v168_v39 = vmul.f32 %v160_v33, %v128_v6  ;;  %v162_v40 = vmul.f32 0.5, %v154_v34  ;;  %v156_v41 = vadd.f32 1.0, %v277_v35 }
  0x26   : > { %175 = vst [vmem:[%s317_s15 + $0x10] sm:$0xff] %v167_v36  ;;  %v169_v42 = vmul.f32 %v161_v37, %v129_v7  ;;  %v163_v43 = vmul.f32 0.5, %v155_v38 }
  0x27   : > { %176 = vst [vmem:[%s317_s15 + $0x18] sm:$0xff] %v168_v39  ;;  %v170_v44 = vmul.f32 %v162_v40, %v130_v8  ;;  %v164_v45 = vmul.f32 0.5, %v156_v41 }
  0x28   : > { %177 = vst [vmem:[%s317_s15 + $0x20] sm:$0xff] %v169_v42  ;;  %v171_v46 = vmul.f32 %v163_v43, %v131_v10 }
  0x29   : > { %178 = vst [vmem:[%s317_s15 + $0x28] sm:$0xff] %v170_v44  ;;  %v172_v47 = vmul.f32 %v164_v45, %v132_v12 }
  0x2a   : > { %179 = vst [vmem:[%s317_s15 + $0x30] sm:$0xff] %v171_v46 }
  0x2b   : > { %180 = vst [vmem:[%s317_s15 + $0x38] sm:$0xff] %v172_v47 }
  0x2c PF: > { %s11_s6 = sadd.s32 1, %s284_s6  }
  0x2d   : > { %p8_p4 = scmp.ge.s32.totalorder %s11_s6, 6  }
  0x2f   :  { %10 = sbr.rel (!%p8_p4) target bundleno = 1 (0x1), region = 54 }

</bundles_post_ra>
